<compile_context>
chip_gen: v7x
topology: tpu7x:2x2x1
jax: 0.10.0
libtpu: 0.0.40
codegen_flags: <defaults>
</compile_context>

<pallas_src>
import numpy as np
import jax
import jax.numpy as jnp
from jax.experimental import pallas as pl
from jax.experimental.pallas import tpu as pltpu

LANE = 128                        # every feature/lane dim is zero-padded to this width
HID1, HID2, HID3 = 128, 64, 32    # logical hidden widths of the torch module
_TILE_CHOICES = (2048, 1024, 512)


def _round_up(x, m):
    return (x + m - 1) // m * m


def _tiling(n):
    """(padded N, row tile tm, contraction tile tk) with tm | n_pad and tk | n_pad."""
    if n <= 1024:
        n_pad = _round_up(max(n, 8), 128)
        # >=2 row blocks when possible so both v7x TensorCores get work
        tm = n_pad // 2 if n_pad >= 256 else n_pad
        return n_pad, tm, n_pad
    n_pad = _round_up(n, 512)                       # modest pad, no lcm blowup
    tk = max(t for t in _TILE_CHOICES if n_pad % t == 0)
    tm = tk if n_pad // tk >= 2 else tk // 2        # keep >=2 row blocks
    return n_pad, tm, tk


def padded_num_nodes(n):
    return _tiling(n)[0]


def _vmem_capacity_bytes():
    try:
        cap = getattr(pltpu.get_tpu_info(), "vmem_capacity_bytes", None)
        if cap:
            return int(cap)
    except Exception:
        pass
    return 64 << 20      # conservative default = v7x per-TensorCore VMEM


def _plan(n_pad, tm, tk, out_itemsize):
    """Decide whether the projected H stays VMEM-resident and pick vmem_limit_bytes."""
    budget = int(0.7 * _vmem_capacity_bytes())
    bf16 = 2
    a_need = 2 * tm * tk * bf16                      # double-buffered A_hat tile
    h_resident = 2 * n_pad * LANE * bf16             # full HW (assume 2 buffers)
    h_stream = 2 * tk * LANE * bf16                  # double-buffered HW tile
    fixed = (tm * LANE * 4                           # f32 accumulator
             + 2 * tm * LANE * out_itemsize          # output tile
             + 2 * LANE * LANE * bf16                # Wc
             + 2 * LANE * 4)                         # bias
    resident = a_need + h_resident + fixed <= budget
    need = a_need + (h_resident if resident else h_stream) + fixed
    limit = int(min(max(2 * need, 16 << 20), budget))
    return resident, limit


# --------------------------------------------------------------------------------------
# Pallas kernels:  O = relu(A_hat @ HW + b)        (HW = H @ W precomputed)
#                  scores = relu(A_hat @ HW + b) @ Wc   (last layer, classifier folded in)
# --------------------------------------------------------------------------------------
def _make_kernel(tk, resident_rows, with_classifier):
    """resident_rows: None => HW streamed per-k tile; else full HW row count in VMEM."""

    def kernel(*refs):
        if with_classifier:
            a_ref, h_ref, b_ref, wc_ref, o_ref, acc_ref = refs
        else:
            a_ref, h_ref, b_ref, o_ref, acc_ref = refs

        k = pl.program_id(1)

        @pl.when(k == 0)
        def _():
            acc_ref[...] = jnp.zeros_like(acc_ref)

        if resident_rows is None or resident_rows == tk:
            h = h_ref[...]
        else:
            start = pl.multiple_of(k * tk, tk)
            h = h_ref[pl.ds(start, tk), :]

        acc_ref[...] += jnp.dot(a_ref[...], h, preferred_element_type=jnp.float32)

        @pl.when(k == pl.num_programs(1) - 1)
        def _():
            z = jnp.maximum(acc_ref[...] + b_ref[...], 0.0)
            if with_classifier:
                o_ref[...] = jnp.dot(z.astype(wc_ref.dtype), wc_ref[...],
                                     preferred_element_type=jnp.float32
                                     ).astype(o_ref.dtype)
            else:
                o_ref[...] = z.astype(o_ref.dtype)

    return kernel


def _gcn_propagate(a, hw, b, wc=None, *, out_dtype, tm, tk):
    """Tiled A_hat @ HW with bias+ReLU (and optional classifier) fused in the epilogue."""
    n_pad = a.shape[0]
    grid = (n_pad // tm, n_pad // tk)
    resident, vmem_limit = _plan(n_pad, tm, tk, jnp.dtype(out_dtype).itemsize)

    if resident:   # single fetch of the full projected-H matrix, sliced in-kernel
        h_spec = pl.BlockSpec((n_pad, LANE), lambda i, k: (0, 0))
    else:          # stream the k-slice of HW from HBM each step
        h_spec = pl.BlockSpec((tk, LANE), lambda i, k: (k, 0))

    in_specs = [
        pl.BlockSpec((tm, tk), lambda i, k: (i, k)),      # A_hat tile (the HBM stream)
        h_spec,                                           # projected H
        pl.BlockSpec((1, LANE), lambda i, k: (0, 0)),     # bias (resident)
    ]
    args = [a, hw, b]
    if wc is not None:
        in_specs.append(pl.BlockSpec((LANE, LANE), lambda i, k: (0, 0)))  # Wc (resident)
        args.append(wc)

    kernel = _make_kernel(tk, n_pad if resident else None, wc is not None)

    return pl.pallas_call(
        kernel,
        out_shape=jax.ShapeDtypeStruct((n_pad, LANE), out_dtype),
        grid_spec=pltpu.PrefetchScalarGridSpec(
            num_scalar_prefetch=0,
            grid=grid,
            in_specs=in_specs,
            out_specs=pl.BlockSpec((tm, LANE), lambda i, k: (i, 0)),
            scratch_shapes=[pltpu.VMEM((tm, LANE), jnp.float32)],
        ),
        compiler_params=pltpu.CompilerParams(
            dimension_semantics=("parallel", "arbitrary"),
            vmem_limit_bytes=vmem_limit,
        ),
    )(*args)


# --------------------------------------------------------------------------------------
# Plain-JAX glue
# --------------------------------------------------------------------------------------
def build_normalized_adjacency(edge_index, num_nodes, n_pad=None, dtype=jnp.bfloat16):
    """Dense A_hat = D^{-1/2} (A + I_remaining) D^{-1/2}, built directly at padded size.

    Matches PyG gcn_norm semantics: self-loops are only added to nodes that don't
    already have one.  Padded rows/cols stay exactly zero (degree 0 -> scale 0).
    """
    if n_pad is None:
        n_pad = num_nodes
    src, dst = edge_index[0], edge_index[1]
    a = jnp.zeros((n_pad, n_pad), jnp.float32).at[dst, src].add(1.0)
    node = jnp.arange(n_pad)
    diag = a[node, node]
    add_loop = jnp.where((diag > 0) | (node >= num_nodes), 0.0, 1.0)
    a = a.at[node, node].add(add_loop)
    deg = jnp.sum(a, axis=1)
    d_inv_sqrt = jnp.where(deg > 0, 1.0 / jnp.sqrt(deg), 0.0)
    return (d_inv_sqrt[:, None] * a * d_inv_sqrt[None, :]).astype(dtype)


def _pad2(w, rows, cols):
    return jnp.pad(w, ((0, rows - w.shape[0]), (0, cols - w.shape[1])))


def prepare_params(params):
    """Zero-pad weights/biases to 128-lane shapes.

    Projection weights stay f32 (they are applied in cheap XLA glue); only the
    classifier weight Wc (used inside the Pallas epilogue) goes to bf16.
    """
    f = params["w1"].shape[0]

    w1 = _pad2(params["w1"], f, LANE)        # (f, 128): extra output cols are zero
    w2 = _pad2(params["w2"], LANE, LANE)     # (128, 128)
    w3 = _pad2(params["w3"], LANE, LANE)     # rows 64.. and cols 32.. are zero

    wc = jnp.zeros((LANE, LANE), jnp.float32)
    wc = wc.at[:HID3, 0].set(params["wc"][:HID3, 0])   # src half of classifier -> lane 0
    wc = wc.at[:HID3, 1].set(params["wc"][HID3:, 0])   # dst half of classifier -> lane 1

    def padb(b):
        return jnp.pad(b, (0, LANE - b.shape[0])).reshape(1, LANE).astype(jnp.float32)

    return {
        "w1": w1, "b1": padb(params["b1"]),
        "w2": w2, "b2": padb(params["b2"]),
        "w3": w3, "b3": padb(params["b3"]),
        "wc": wc.astype(jnp.bfloat16), "bc": params["bc"],
    }


def modified_edge_classifier_forward(params, x, edge_index, a_hat=None):
    """Eval-mode forward pass of ModifiedEdgeClassifier (dropout == identity).

    For a static graph, build `a_hat` once with build_normalized_adjacency(...,
    n_pad=padded_num_nodes(N)) and pass it in so it is not rebuilt every call.
    """
    n, f = x.shape
    n_pad, tm, tk = _tiling(n)
    p = prepare_params(params)

    if a_hat is None:
        a_hat = build_normalized_adjacency(edge_index, n, n_pad=n_pad)
    assert a_hat.shape == (n_pad, n_pad), "prebuilt a_hat must use padded_num_nodes(n)"

    h0 = jnp.pad(x, ((0, n_pad - n), (0, 0)))           # rows padded, features as-is

    def project(h, w):   # cheap XLA glue: (N, hdim) x (hdim, 128), f32 accumulate
        return jnp.dot(h, w, preferred_element_type=jnp.float32).astype(jnp.bfloat16)

    # Hot path: three tiled aggregations (Pallas); classifier folded into layer 3.
    h1 = _gcn_propagate(a_hat, project(h0, p["w1"]), p["b1"],
                        out_dtype=jnp.bfloat16, tm=tm, tk=tk)
    h2 = _gcn_propagate(a_hat, project(h1, p["w2"]), p["b2"],
                        out_dtype=jnp.bfloat16, tm=tm, tk=tk)
    scores = _gcn_propagate(a_hat, project(h2, p["w3"]), p["b3"], wc=p["wc"],
                            out_dtype=jnp.float32, tm=tm, tk=tk)

    # Glue: edge logits = s_src[start] + s_dst[end] + bc  (scalar gather, no (E,64) matrix)
    start, end = edge_index[0], edge_index[1]
    logits = scores[start, 0] + scores[end, 1] + params["bc"][0]
    return logits[:, None]


def init_params(key, num_features):
    ks = jax.random.split(key, 5)

    def glorot(k, fan_in, fan_out):
        lim = jnp.sqrt(6.0 / (fan_in + fan_out))
        return jax.random.uniform(k, (fan_in, fan_out), jnp.float32, -lim, lim)

    return {
        "w1": glorot(ks[0], num_features, HID1), "b1": jnp.zeros((HID1,), jnp.float32),
        "w2": glorot(ks[1], HID1, HID2),         "b2": jnp.zeros((HID2,), jnp.float32),
        "w3": glorot(ks[2], HID2, HID3),         "b3": jnp.zeros((HID3,), jnp.float32),
        "wc": glorot(ks[3], 2 * HID3, 1),
        "bc": jax.random.uniform(ks[4], (1,), jnp.float32, -0.1, 0.1),
    }


# --------------------------------------------------------------------------------------
def _reference_forward(params, x, edge_index):
    """Pure-JAX f32 reference of the same math, for a correctness check."""
    a_hat = build_normalized_adjacency(edge_index, x.shape[0], dtype=jnp.float32)
    h = x
    for w, b in ((params["w1"], params["b1"]),
                 (params["w2"], params["b2"]),
                 (params["w3"], params["b3"])):
        h = jnp.maximum(a_hat @ (h @ w) + b[None, :], 0.0)
    start, end = edge_index[0], edge_index[1]
    ef = jnp.concatenate([h[start], h[end]], axis=1)
    return ef @ params["wc"] + params["bc"][None, :]


if __name__ == "__main__":
    key = jax.random.PRNGKey(0)
    k_x, k_e, k_p = jax.random.split(key, 3)

    NUM_NODES = 16
    NUM_FEATURES = 8
    NUM_EDGES = 32

    x = jax.random.normal(k_x, (NUM_NODES, NUM_FEATURES), jnp.float32)
    edge_index = jax.random.randint(k_e, (2, NUM_EDGES), 0, NUM_NODES, jnp.int32)
    params = init_params(k_p, NUM_FEATURES)

    # Static graph: build the padded bf16 A_hat once and reuse it across calls.
    n_pad = padded_num_nodes(NUM_NODES)
    a_hat = build_normalized_adjacency(edge_index, NUM_NODES, n_pad=n_pad)

    fwd = jax.jit(modified_edge_classifier_forward)
    out = jax.block_until_ready(fwd(params, x, edge_index, a_hat))

    ref = _reference_forward(params, x, edge_index)
    assert out.shape == (NUM_EDGES, 1)
    # bf16 data path vs f32 reference -> loose tolerance
    np.testing.assert_allclose(np.asarray(out), np.asarray(ref), rtol=5e-2, atol=5e-2)

    print("KERNEL_OK")
</pallas_src>

<mosaic_0001>
module attributes {stable_mosaic.version = 11 : i64} {
  func.func @kernel(%arg0: i32, %arg1: i32, %arg2: memref<128x128xbf16, #tpu.memory_space<vmem>>, %arg3: memref<128x128xbf16, #tpu.memory_space<vmem>>, %arg4: memref<1x128xf32, #tpu.memory_space<vmem>>, %arg5: memref<128x128xbf16, #tpu.memory_space<vmem>>, %arg6: memref<128x128xf32, #tpu.memory_space<vmem>>) attributes {dimension_semantics = [#tpu.dimension_semantics<parallel>, #tpu.dimension_semantics<arbitrary>], iteration_bounds = array<i64: 1, 1>, scalar_prefetch = 0 : i64, scratch_operands = 1 : i64, tpu.core_type = #tpu.core_type<tc>, window_params = [{transform_indices = @transform_0, window_bounds = array<i64: 128, 128>}, {pipeline_mode = #tpu.pipeline_mode<synchronous>, transform_indices = @transform_1, window_bounds = array<i64: 128, 128>}, {pipeline_mode = #tpu.pipeline_mode<synchronous>, transform_indices = @transform_2, window_bounds = array<i64: 1, 128>}, {transform_indices = @transform_3, window_bounds = array<i64: 128, 128>}]} {
    %c0_i32 = arith.constant 0 : i32
    %0 = arith.cmpi eq, %arg1, %c0_i32 : i32
    %1 = arith.extui %0 : i1 to i32
    %c0_i32_0 = arith.constant 0 : i32
    %2 = arith.cmpi ne, %1, %c0_i32_0 : i32
    scf.if %2 {
      %cst_10 = arith.constant 0.000000e+00 : f32
      %12 = vector.broadcast %cst_10 : f32 to vector<128x128xf32>
      %c0_11 = arith.constant 0 : index
      %c0_12 = arith.constant 0 : index
      %13 = vector.load %arg6[%c0_11, %c0_12] : memref<128x128xf32, #tpu.memory_space<vmem>>, vector<128x128xf32>
      tpu.vector_store %arg6[%c0_11, %c0_12], %12 {strides = array<i32>} : memref<128x128xf32, #tpu.memory_space<vmem>>, vector<128x128xf32>,
    } else {
    }
    %c0 = arith.constant 0 : index
    %c0_1 = arith.constant 0 : index
    %3 = vector.load %arg3[%c0, %c0_1] : memref<128x128xbf16, #tpu.memory_space<vmem>>, vector<128x128xbf16>
    %c0_2 = arith.constant 0 : index
    %c0_3 = arith.constant 0 : index
    %4 = vector.load %arg6[%c0_2, %c0_3] : memref<128x128xf32, #tpu.memory_space<vmem>>, vector<128x128xf32>
    %c0_4 = arith.constant 0 : index
    %c0_5 = arith.constant 0 : index
    %5 = vector.load %arg2[%c0_4, %c0_5] : memref<128x128xbf16, #tpu.memory_space<vmem>>, vector<128x128xbf16>
    %cst = arith.constant dense<0.000000e+00> : vector<128x128xf32>
    %6 = tpu.matmul %5, %3, %cst {dimension_numbers = #tpu.dot_dimension_numbers<[1], [0], [0], [1], [0, 0, 1, 1], [], []>} : vector<128x128xbf16>, vector<128x128xbf16>, vector<128x128xf32> -> vector<128x128xf32>
    %7 = arith.addf %4, %6 : vector<128x128xf32>
    %c0_6 = arith.constant 0 : index
    %c0_7 = arith.constant 0 : index
    %8 = vector.load %arg6[%c0_6, %c0_7] : memref<128x128xf32, #tpu.memory_space<vmem>>, vector<128x128xf32>
    tpu.vector_store %arg6[%c0_6, %c0_7], %7 {strides = array<i32>} : memref<128x128xf32, #tpu.memory_space<vmem>>, vector<128x128xf32>,
    %c0_i32_8 = arith.constant 0 : i32
    %9 = arith.cmpi eq, %arg1, %c0_i32_8 : i32
    %10 = arith.extui %9 : i1 to i32
    %c0_i32_9 = arith.constant 0 : i32
    %11 = arith.cmpi ne, %10, %c0_i32_9 : i32
    scf.if %11 {
      %c0_10 = arith.constant 0 : index
      %c0_11 = arith.constant 0 : index
      %12 = vector.load %arg6[%c0_10, %c0_11] : memref<128x128xf32, #tpu.memory_space<vmem>>, vector<128x128xf32>
      %c0_12 = arith.constant 0 : index
      %c0_13 = arith.constant 0 : index
      %13 = vector.load %arg4[%c0_12, %c0_13] : memref<1x128xf32, #tpu.memory_space<vmem>>, vector<1x128xf32>
      %14 = vector.broadcast %13 : vector<1x128xf32> to vector<128x128xf32>
      %15 = arith.addf %12, %14 : vector<128x128xf32>
      %cst_14 = arith.constant 0.000000e+00 : f32
      %16 = vector.broadcast %cst_14 : f32 to vector<128x128xf32>
      %17 = arith.maximumf %15, %16 : vector<128x128xf32>
      %18 = arith.truncf %17 : vector<128x128xf32> to vector<128x128xbf16>
      %c0_15 = arith.constant 0 : index
      %c0_16 = arith.constant 0 : index
      %19 = vector.load %arg5[%c0_15, %c0_16] : memref<128x128xbf16, #tpu.memory_space<vmem>>, vector<128x128xbf16>
      tpu.vector_store %arg5[%c0_15, %c0_16], %18 {strides = array<i32>} : memref<128x128xbf16, #tpu.memory_space<vmem>>, vector<128x128xbf16>,
    } else {
    }
    return
  }
  func.func @transform_0(%arg0: i32, %arg1: i32) -> (i32, i32) {
    %c0_i32 = arith.constant 0 : i32
    return %arg0, %arg1 : i32, i32
  }
  func.func @transform_1(%arg0: i32, %arg1: i32) -> (i32, i32) {
    %c0_i32 = arith.constant 0 : i32
    %c0_i32_0 = arith.constant 0 : i32
    %c0_i32_1 = arith.constant 0 : i32
    return %c0_i32, %c0_i32_0 : i32, i32
  }
  func.func @transform_2(%arg0: i32, %arg1: i32) -> (i32, i32) {
    %c0_i32 = arith.constant 0 : i32
    %c0_i32_0 = arith.constant 0 : i32
    %c0_i32_1 = arith.constant 0 : i32
    return %c0_i32, %c0_i32_0 : i32, i32
  }
  func.func @transform_3(%arg0: i32, %arg1: i32) -> (i32, i32) {
    %c0_i32 = arith.constant 0 : i32
    %c0_i32_0 = arith.constant 0 : i32
    return %arg0, %c0_i32 : i32, i32
  }
}

module attributes {stable_mosaic.version = 11 : i64} {
  func.func @kernel(%arg0: i32, %arg1: i32, %arg2: memref<128x128xbf16, #tpu.memory_space<vmem>>, %arg3: memref<128x128xbf16, #tpu.memory_space<vmem>>, %arg4: memref<1x128xf32, #tpu.memory_space<vmem>>, %arg5: memref<128x128xbf16, #tpu.memory_space<vmem>>, %arg6: memref<128x128xf32, #tpu.memory_space<vmem>>, %arg7: memref<128x128xf32, #tpu.memory_space<vmem>>) attributes {dimension_semantics = [#tpu.dimension_semantics<parallel>, #tpu.dimension_semantics<arbitrary>], iteration_bounds = array<i64: 1, 1>, scalar_prefetch = 0 : i64, scratch_operands = 1 : i64, tpu.core_type = #tpu.core_type<tc>, window_params = [{transform_indices = @transform_0, window_bounds = array<i64: 128, 128>}, {pipeline_mode = #tpu.pipeline_mode<synchronous>, transform_indices = @transform_1, window_bounds = array<i64: 128, 128>}, {pipeline_mode = #tpu.pipeline_mode<synchronous>, transform_indices = @transform_2, window_bounds = array<i64: 1, 128>}, {pipeline_mode = #tpu.pipeline_mode<synchronous>, transform_indices = @transform_3, window_bounds = array<i64: 128, 128>}, {transform_indices = @transform_4, window_bounds = array<i64: 128, 128>}]} {
    %c0_i32 = arith.constant 0 : i32
    %0 = arith.cmpi eq, %arg1, %c0_i32 : i32
    %1 = arith.extui %0 : i1 to i32
    %c0_i32_0 = arith.constant 0 : i32
    %2 = arith.cmpi ne, %1, %c0_i32_0 : i32
    scf.if %2 {
      %cst_10 = arith.constant 0.000000e+00 : f32
      %12 = vector.broadcast %cst_10 : f32 to vector<128x128xf32>
      %c0_11 = arith.constant 0 : index
      %c0_12 = arith.constant 0 : index
      %13 = vector.load %arg7[%c0_11, %c0_12] : memref<128x128xf32, #tpu.memory_space<vmem>>, vector<128x128xf32>
      tpu.vector_store %arg7[%c0_11, %c0_12], %12 {strides = array<i32>} : memref<128x128xf32, #tpu.memory_space<vmem>>, vector<128x128xf32>,
    } else {
    }
    %c0 = arith.constant 0 : index
    %c0_1 = arith.constant 0 : index
    %3 = vector.load %arg3[%c0, %c0_1] : memref<128x128xbf16, #tpu.memory_space<vmem>>, vector<128x128xbf16>
    %c0_2 = arith.constant 0 : index
    %c0_3 = arith.constant 0 : index
    %4 = vector.load %arg7[%c0_2, %c0_3] : memref<128x128xf32, #tpu.memory_space<vmem>>, vector<128x128xf32>
    %c0_4 = arith.constant 0 : index
    %c0_5 = arith.constant 0 : index
    %5 = vector.load %arg2[%c0_4, %c0_5] : memref<128x128xbf16, #tpu.memory_space<vmem>>, vector<128x128xbf16>
    %cst = arith.constant dense<0.000000e+00> : vector<128x128xf32>
    %6 = tpu.matmul %5, %3, %cst {dimension_numbers = #tpu.dot_dimension_numbers<[1], [0], [0], [1], [0, 0, 1, 1], [], []>} : vector<128x128xbf16>, vector<128x128xbf16>, vector<128x128xf32> -> vector<128x128xf32>
    %7 = arith.addf %4, %6 : vector<128x128xf32>
    %c0_6 = arith.constant 0 : index
    %c0_7 = arith.constant 0 : index
    %8 = vector.load %arg7[%c0_6, %c0_7] : memref<128x128xf32, #tpu.memory_space<vmem>>, vector<128x128xf32>
    tpu.vector_store %arg7[%c0_6, %c0_7], %7 {strides = array<i32>} : memref<128x128xf32, #tpu.memory_space<vmem>>, vector<128x128xf32>,
    %c0_i32_8 = arith.constant 0 : i32
    %9 = arith.cmpi eq, %arg1, %c0_i32_8 : i32
    %10 = arith.extui %9 : i1 to i32
    %c0_i32_9 = arith.constant 0 : i32
    %11 = arith.cmpi ne, %10, %c0_i32_9 : i32
    scf.if %11 {
      %c0_10 = arith.constant 0 : index
      %c0_11 = arith.constant 0 : index
      %12 = vector.load %arg7[%c0_10, %c0_11] : memref<128x128xf32, #tpu.memory_space<vmem>>, vector<128x128xf32>
      %c0_12 = arith.constant 0 : index
      %c0_13 = arith.constant 0 : index
      %13 = vector.load %arg4[%c0_12, %c0_13] : memref<1x128xf32, #tpu.memory_space<vmem>>, vector<1x128xf32>
      %14 = vector.broadcast %13 : vector<1x128xf32> to vector<128x128xf32>
      %15 = arith.addf %12, %14 : vector<128x128xf32>
      %cst_14 = arith.constant 0.000000e+00 : f32
      %16 = vector.broadcast %cst_14 : f32 to vector<128x128xf32>
      %17 = arith.maximumf %15, %16 : vector<128x128xf32>
      %18 = arith.truncf %17 : vector<128x128xf32> to vector<128x128xbf16>
      %c0_15 = arith.constant 0 : index
      %c0_16 = arith.constant 0 : index
      %19 = vector.load %arg5[%c0_15, %c0_16] : memref<128x128xbf16, #tpu.memory_space<vmem>>, vector<128x128xbf16>
      %cst_17 = arith.constant dense<0.000000e+00> : vector<128x128xf32>
      %20 = tpu.matmul %18, %19, %cst_17 {dimension_numbers = #tpu.dot_dimension_numbers<[1], [0], [0], [1], [0, 0, 1, 1], [], []>} : vector<128x128xbf16>, vector<128x128xbf16>, vector<128x128xf32> -> vector<128x128xf32>
      %c0_18 = arith.constant 0 : index
      %c0_19 = arith.constant 0 : index
      %21 = vector.load %arg6[%c0_18, %c0_19] : memref<128x128xf32, #tpu.memory_space<vmem>>, vector<128x128xf32>
      tpu.vector_store %arg6[%c0_18, %c0_19], %20 {strides = array<i32>} : memref<128x128xf32, #tpu.memory_space<vmem>>, vector<128x128xf32>,
    } else {
    }
    return
  }
  func.func @transform_0(%arg0: i32, %arg1: i32) -> (i32, i32) {
    %c0_i32 = arith.constant 0 : i32
    return %arg0, %arg1 : i32, i32
  }
  func.func @transform_1(%arg0: i32, %arg1: i32) -> (i32, i32) {
    %c0_i32 = arith.constant 0 : i32
    %c0_i32_0 = arith.constant 0 : i32
    %c0_i32_1 = arith.constant 0 : i32
    return %c0_i32, %c0_i32_0 : i32, i32
  }
  func.func @transform_2(%arg0: i32, %arg1: i32) -> (i32, i32) {
    %c0_i32 = arith.constant 0 : i32
    %c0_i32_0 = arith.constant 0 : i32
    %c0_i32_1 = arith.constant 0 : i32
    return %c0_i32, %c0_i32_0 : i32, i32
  }
  func.func @transform_3(%arg0: i32, %arg1: i32) -> (i32, i32) {
    %c0_i32 = arith.constant 0 : i32
    %c0_i32_0 = arith.constant 0 : i32
    %c0_i32_1 = arith.constant 0 : i32
    return %c0_i32, %c0_i32_0 : i32, i32
  }
  func.func @transform_4(%arg0: i32, %arg1: i32) -> (i32, i32) {
    %c0_i32 = arith.constant 0 : i32
    %c0_i32_0 = arith.constant 0 : i32
    return %arg0, %c0_i32 : i32, i32
  }
}

</mosaic_0001>

<bundles_post_ra>
// kernel: modified_edge_classifier_forward.5
= control target key start
LH: loop header
LB: loop body
LE: loop exit
PB: predicated region body
PF: predicated region fallthrough
CT: control target
= control target key end

     0   :  { %s851_s1 = inlined_call_operand.vmem [shape: bf16[128,128], index: 1, kind: input, shape index: {}]   ;;  %s852_s0 = inlined_call_operand.vmem [shape: bf16[128,128], index: 0, kind: input, shape index: {}]   ;;  %s853_s3 = inlined_call_operand.vmem [shape: bf16[128,128], index: 3, kind: input, shape index: {}]   ;;  %s854_s2 = inlined_call_operand.vmem [shape: f32[1,128], index: 2, kind: input, shape index: {}]   ;;  %s855_s4 = inlined_call_operand.vmem [shape: f32[128,128], index: 4, kind: output, shape index: {}]  }
   0x1   :  { %v679_v0 = vld [vmem:[%s851_s1] sm:$0xff]   ;;  %v680_v1 = vld [vmem:[%s851_s1 + $0x8] sm:$0xff]   ;;  %v681_v2 = vld [vmem:[%s851_s1 + $0x10] sm:$0xff]  }
   0x2   :  { %615 = vmatprep.subr.bf16.mxu0 %v679_v0  ;;  %v682_v3 = vld [vmem:[%s851_s1 + $0x18] sm:$0xff]   ;;  %v687_v4 = vld [vmem:[%s852_s0] sm:$0xff]   ;;  %v684_v6 = vld [vmem:[%s851_s1 + $0x28] sm:$0xff]  }
   0x3   :  { %616 = vmatpush3.bf16.msra.mxu0 %v679_v0  ;;  %631 = vmatprep.mubr.bf16.mxu0 %v687_v4  ;;  %v683_v5 = vld [vmem:[%s851_s1 + $0x20] sm:$0xff]   ;;  %v696_v8 = vld [vmem:[%s853_s3 + $0x8] sm:$0xff]   ;;  %v685_v9 = vld [vmem:[%s851_s1 + $0x30] sm:$0xff]  }
   0x4   :  { %617 = vmatprep.subr.bf16.mxu0 %v680_v1  ;;  %v695_v7 = vld [vmem:[%s853_s3] sm:$0xff]   ;;  %v697_v10 = vld [vmem:[%s853_s3 + $0x10] sm:$0xff]   ;;  %v686_v11 = vld [vmem:[%s851_s1 + $0x38] sm:$0xff]  }
   0x5   :  { %647 = vmatprep.subr.bf16.mxu1 %v695_v7  ;;  %v698_v12 = vld [vmem:[%s853_s3 + $0x18] sm:$0xff]   ;;  %v699_v13 = vld [vmem:[%s853_s3 + $0x20] sm:$0xff]   ;;  %v688_v14 = vld [vmem:[%s852_s0 + $0x8] sm:$0xff]  }
   0x6   :  { %648 = vmatpush3.bf16.msra.mxu1 %v695_v7  ;;  %v689_v15 = vld [vmem:[%s852_s0 + $0x10] sm:$0xff]   ;;  %v700_v16 = vld [vmem:[%s853_s3 + $0x28] sm:$0xff]   ;;  %v690_v17 = vld [vmem:[%s852_s0 + $0x18] sm:$0xff]  }
   0x7   :  { %618 = vmatpush3.bf16.msra.mxu0 %v680_v1  ;;  %649 = vmatprep.subr.bf16.mxu1 %v696_v8  ;;  %v691_v18 = vld [vmem:[%s852_s0 + $0x20] sm:$0xff]   ;;  %v692_v19 = vld [vmem:[%s852_s0 + $0x28] sm:$0xff]   ;;  %v693_v20 = vld [vmem:[%s852_s0 + $0x30] sm:$0xff]  }
   0x8   :  { %619 = vmatprep.subr.bf16.mxu0 %v681_v2  ;;  %v694_v21 = vld [vmem:[%s852_s0 + $0x38] sm:$0xff]   ;;  %v701_v22 = vld [vmem:[%s853_s3 + $0x30] sm:$0xff]   ;;  %v574_v24 = vld [vmem:[%s854_s2] ss:$0 sm:$0xff] }
   0x9   :  { %v702_v23 = vld [vmem:[%s853_s3 + $0x38] sm:$0xff]  }
   0xa   :  { %650 = vmatpush3.bf16.msra.mxu1 %v696_v8 }
   0xb   :  { %620 = vmatpush3.bf16.msra.mxu0 %v681_v2  ;;  %651 = vmatprep.subr.bf16.mxu1 %v697_v10 }
   0xc   :  { %621 = vmatprep.subr.bf16.mxu0 %v682_v3 }
   0xe   :  { %652 = vmatpush3.bf16.msra.mxu1 %v697_v10 }
   0xf   :  { %622 = vmatpush3.bf16.msra.mxu0 %v682_v3  ;;  %653 = vmatprep.subr.bf16.mxu1 %v698_v12 }
  0x10   :  { %623 = vmatprep.subr.bf16.mxu0 %v683_v5 }
  0x12   :  { %654 = vmatpush3.bf16.msra.mxu1 %v698_v12 }
  0x13   :  { %624 = vmatpush3.bf16.msra.mxu0 %v683_v5  ;;  %655 = vmatprep.subr.bf16.mxu1 %v699_v13 }
  0x14   :  { %625 = vmatprep.subr.bf16.mxu0 %v684_v6 }
  0x16   :  { %656 = vmatpush3.bf16.msra.mxu1 %v699_v13 }
  0x17   :  { %626 = vmatpush3.bf16.msra.mxu0 %v684_v6  ;;  %657 = vmatprep.subr.bf16.mxu1 %v700_v16 }
  0x18   :  { %627 = vmatprep.subr.bf16.mxu0 %v685_v9 }
  0x1a   :  { %658 = vmatpush3.bf16.msra.mxu1 %v700_v16 }
  0x1b   :  { %628 = vmatpush3.bf16.msra.mxu0 %v685_v9  ;;  %659 = vmatprep.subr.bf16.mxu1 %v701_v22 }
  0x1c   :  { %629 = vmatprep.subr.bf16.mxu0 %v686_v11 }
  0x1e   :  { %660 = vmatpush3.bf16.msra.mxu1 %v701_v22 }
  0x1f   :  { %630 = vmatpush3.bf16.msra.mxu0 %v686_v11  ;;  %661 = vmatprep.subr.bf16.mxu1 %v702_v23 }
  0x22   :  { %632 = vmatmul.mubr.bf16.vlgmr.msra.gmra.mrb[0].mxu0 %v688_v14  ;;  %662 = vmatpush3.bf16.msra.mxu1 %v702_v23 }
  0x23   :  { %635 = vmatprep.mubr.bf16.mxu0 %v689_v15 }
  0x2a   :  { %636 = vmatmul.mubr.bf16.gmra.mrb[4].mxu0 %v690_v17 }
  0x2b   :  { %639 = vmatprep.mubr.bf16.mxu0 %v691_v18 }
  0x32   :  { %640 = vmatmul.mubr.bf16.gmra.mrb[8].mxu0 %v692_v19 }
  0x33   :  { %643 = vmatprep.mubr.bf16.mxu0 %v693_v20 }
  0x3a   :  { %644 = vmatmul.mubr.bf16.gmra.mrb[12].mxu0 %v694_v21 }
  0xf5   :  { %v633_v25 = vpop.f32.mrb[0].mxu0 }
  0xf6   :  { %v339_v26 = vadd.f32 %v633_v25, %v574_v24  ;;  %v216_v27 = vpop.f32.mrb[1].mxu0 }
  0xf7   :  { %v337_v28 = vadd.f32 %v574_v24, %v216_v27  ;;  %v634_v29 = vpop.f32.mrb[2].mxu0 }
  0xf8   :  { %v340_v30 = vadd.f32 %v634_v29, %v574_v24  ;;  %v219_v31 = vpop.f32.mrb[3].mxu0  ;;  %v355_v33 = vmax.f32 %v339_v26, 0.0 }
  0xf9   :  { %v338_v32 = vadd.f32 %v574_v24, %v219_v31  ;;  %v353_v35 = vmax.f32 %v337_v28, 0.0 }
  0xfa   :  { %v356_v34 = vmax.f32 %v340_v30, 0.0 }
  0xfb   :  { %v354_v36 = vmax.f32 %v338_v32, 0.0 }
  0xfc   :  { %v370_v37 = vpack.c.bf16 %v356_v34, %v355_v33 }
  0xfd   :  { %v637_v38 = vpop.f32.mrb[4].mxu0  ;;  %v369_v39 = vpack.c.bf16 %v354_v36, %v353_v35 }
  0xfe   :  { %v343_v40 = vadd.f32 %v637_v38, %v574_v24  ;;  %v232_v41 = vpop.f32.mrb[5].mxu0 }
  0xff   :  { %v341_v42 = vadd.f32 %v574_v24, %v232_v41  ;;  %v638_v43 = vpop.f32.mrb[6].mxu0  ;;  %663 = vmatprep.mubr.bf16.mxu1 %v369_v39 }
 0x100   :  { %v344_v44 = vadd.f32 %v638_v43, %v574_v24  ;;  %v235_v45 = vpop.f32.mrb[7].mxu0  ;;  %664 = vmatmul.mubr.bf16.vlgmr.msra.gmra.mrb[0].mxu1 %v370_v37  ;;  %v359_v47 = vmax.f32 %v343_v40, 0.0 }
 0x101   :  { %v342_v46 = vadd.f32 %v574_v24, %v235_v45  ;;  %v357_v49 = vmax.f32 %v341_v42, 0.0 }
 0x102   :  { %v360_v48 = vmax.f32 %v344_v44, 0.0 }
 0x103   :  { %v358_v50 = vmax.f32 %v342_v46, 0.0 }
 0x104   :  { %v372_v51 = vpack.c.bf16 %v360_v48, %v359_v47 }
 0x105   :  { %v371_v52 = vpack.c.bf16 %v358_v50, %v357_v49  ;;  %v641_v53 = vpop.f32.mrb[8].mxu0 }
 0x106   :  { %v347_v54 = vadd.f32 %v641_v53, %v574_v24  ;;  %v248_v55 = vpop.f32.mrb[9].mxu0 }
 0x107   :  { %v345_v56 = vadd.f32 %v574_v24, %v248_v55  ;;  %v642_v57 = vpop.f32.mrb[10].mxu0  ;;  %667 = vmatprep.mubr.bf16.mxu1 %v371_v52 }
 0x108   :  { %v348_v58 = vadd.f32 %v642_v57, %v574_v24  ;;  %v251_v59 = vpop.f32.mrb[11].mxu0  ;;  %668 = vmatmul.mubr.bf16.gmra.mrb[4].mxu1 %v372_v51  ;;  %v363_v61 = vmax.f32 %v347_v54, 0.0 }
 0x109   :  { %v346_v60 = vadd.f32 %v574_v24, %v251_v59  ;;  %v361_v63 = vmax.f32 %v345_v56, 0.0 }
 0x10a   :  { %v364_v62 = vmax.f32 %v348_v58, 0.0 }
 0x10b   :  { %v362_v0 = vmax.f32 %v346_v60, 0.0 }
 0x10c   :  { %v374_v1 = vpack.c.bf16 %v364_v62, %v363_v61 }
 0x10d   :  { %v373_v2 = vpack.c.bf16 %v362_v0, %v361_v63  ;;  %v645_v3 = vpop.f32.mrb[12].mxu0 }
 0x10e   :  { %v351_v4 = vadd.f32 %v645_v3, %v574_v24  ;;  %v264_v5 = vpop.f32.mrb[13].mxu0 }
 0x10f   :  { %v349_v6 = vadd.f32 %v574_v24, %v264_v5  ;;  %v646_v7 = vpop.f32.mrb[14].mxu0  ;;  %671 = vmatprep.mubr.bf16.mxu1 %v373_v2 }
 0x110   :  { %v352_v8 = vadd.f32 %v646_v7, %v574_v24  ;;  %v267_v9 = vpop.f32.mrb[15].mxu0  ;;  %672 = vmatmul.mubr.bf16.gmra.mrb[8].mxu1 %v374_v1  ;;  %v367_v11 = vmax.f32 %v351_v4, 0.0 }
 0x111   :  { %v350_v10 = vadd.f32 %v574_v24, %v267_v9  ;;  %v365_v13 = vmax.f32 %v349_v6, 0.0 }
 0x112   :  { %v368_v12 = vmax.f32 %v352_v8, 0.0 }
 0x113   :  { %v366_v14 = vmax.f32 %v350_v10, 0.0 }
 0x114   :  { %v376_v15 = vpack.c.bf16 %v368_v12, %v367_v11 }
 0x115   :  { %v375_v16 = vpack.c.bf16 %v366_v14, %v365_v13 }
 0x117   :  { %675 = vmatprep.mubr.bf16.mxu1 %v375_v16 }
 0x118   :  { %676 = vmatmul.mubr.bf16.gmra.mrb[12].mxu1 %v376_v15 }
 0x1d3   :  { %v665_v17 = vpop.f32.mrb[0].mxu1 }
 0x1d4   :  { %540 = vst [vmem:[%s855_s4 + $0x10] sm:$0xff] %v665_v17  ;;  %v475_v18 = vpop.f32.mrb[1].mxu1 }
 0x1d5   :  { %538 = vst [vmem:[%s855_s4] sm:$0xff] %v475_v18  ;;  %v666_v19 = vpop.f32.mrb[2].mxu1 }
 0x1d6   :  { %541 = vst [vmem:[%s855_s4 + $0x18] sm:$0xff] %v666_v19  ;;  %v478_v20 = vpop.f32.mrb[3].mxu1 }
 0x1d7   :  { %539 = vst [vmem:[%s855_s4 + $0x8] sm:$0xff] %v478_v20 }
 0x1db   :  { %v669_v21 = vpop.f32.mrb[4].mxu1 }
 0x1dc   :  { %544 = vst [vmem:[%s855_s4 + $0x30] sm:$0xff] %v669_v21  ;;  %v491_v22 = vpop.f32.mrb[5].mxu1 }
 0x1dd   :  { %542 = vst [vmem:[%s855_s4 + $0x20] sm:$0xff] %v491_v22  ;;  %v670_v23 = vpop.f32.mrb[6].mxu1 }
 0x1de   :  { %545 = vst [vmem:[%s855_s4 + $0x38] sm:$0xff] %v670_v23  ;;  %v494_v24 = vpop.f32.mrb[7].mxu1 }
 0x1df   :  { %543 = vst [vmem:[%s855_s4 + $0x28] sm:$0xff] %v494_v24 }
 0x1e3   :  { %v673_v25 = vpop.f32.mrb[8].mxu1 }
 0x1e4   :  { %548 = vst [vmem:[%s855_s4 + $0x50] sm:$0xff] %v673_v25  ;;  %v507_v26 = vpop.f32.mrb[9].mxu1 }
 0x1e5   :  { %546 = vst [vmem:[%s855_s4 + $0x40] sm:$0xff] %v507_v26  ;;  %v674_v27 = vpop.f32.mrb[10].mxu1 }
 0x1e6   :  { %549 = vst [vmem:[%s855_s4 + $0x58] sm:$0xff] %v674_v27  ;;  %v510_v28 = vpop.f32.mrb[11].mxu1 }
 0x1e7   :  { %547 = vst [vmem:[%s855_s4 + $0x48] sm:$0xff] %v510_v28 }
 0x1eb   :  { %v677_v29 = vpop.f32.mrb[12].mxu1 }
 0x1ec   :  { %552 = vst [vmem:[%s855_s4 + $0x70] sm:$0xff] %v677_v29  ;;  %v523_v30 = vpop.f32.mrb[13].mxu1 }
 0x1ed   :  { %550 = vst [vmem:[%s855_s4 + $0x60] sm:$0xff] %v523_v30  ;;  %v678_v31 = vpop.f32.mrb[14].mxu1 }
 0x1ee   :  { %553 = vst [vmem:[%s855_s4 + $0x78] sm:$0xff] %v678_v31  ;;  %v526_v32 = vpop.f32.mrb[15].mxu1 }
 0x1ef   :  { %551 = vst [vmem:[%s855_s4 + $0x68] sm:$0xff] %v526_v32 }

// kernel: modified_edge_classifier_forward.3
= control target key start
LH: loop header
LB: loop body
LE: loop exit
PB: predicated region body
PF: predicated region fallthrough
CT: control target
= control target key end

     0   :  { %s578_s1 = inlined_call_operand.vmem [shape: bf16[128,128], index: 1, kind: input, shape index: {}]   ;;  %s579_s0 = inlined_call_operand.vmem [shape: bf16[128,128], index: 0, kind: input, shape index: {}]   ;;  %s580_s2 = inlined_call_operand.vmem [shape: f32[1,128], index: 2, kind: input, shape index: {}]   ;;  %s581_s3 = inlined_call_operand.vmem [shape: bf16[128,128], index: 3, kind: output, shape index: {}]  }
   0x1   :  { %v467_v0 = vld [vmem:[%s578_s1] sm:$0xff]   ;;  %v468_v1 = vld [vmem:[%s578_s1 + $0x8] sm:$0xff]   ;;  %v469_v2 = vld [vmem:[%s578_s1 + $0x10] sm:$0xff]  }
   0x2   :  { %419 = vmatprep.subr.bf16.mxu0 %v467_v0  ;;  %451 = vmatprep.subr.bf16.mxu1 %v467_v0  ;;  %v470_v3 = vld [vmem:[%s578_s1 + $0x18] sm:$0xff]   ;;  %v475_v4 = vld [vmem:[%s579_s0] sm:$0xff]   ;;  %v472_v7 = vld [vmem:[%s578_s1 + $0x28] sm:$0xff]  }
   0x3   :  { %420 = vmatpush3.bf16.msra.mxu0 %v467_v0  ;;  %459 = vmatpush3.bf16.msra.mxu1 %v467_v0  ;;  %v476_v5 = vld [vmem:[%s579_s0 + $0x20] sm:$0xff]   ;;  %v473_v8 = vld [vmem:[%s578_s1 + $0x30] sm:$0xff]   ;;  %v474_v9 = vld [vmem:[%s578_s1 + $0x38] sm:$0xff]  }
   0x4   :  { %421 = vmatprep.subr.bf16.mxu0 %v468_v1  ;;  %452 = vmatprep.subr.bf16.mxu1 %v468_v1  ;;  %v471_v6 = vld [vmem:[%s578_s1 + $0x20] sm:$0xff]   ;;  %v477_v10 = vld [vmem:[%s579_s0 + $0x8] sm:$0xff]   ;;  %v479_v12 = vld [vmem:[%s579_s0 + $0x10] sm:$0xff]  }
   0x5   :  { %435 = vmatprep.mubr.bf16.mxu0 %v475_v4  ;;  %443 = vmatprep.mubr.bf16.mxu1 %v476_v5  ;;  %v478_v11 = vld [vmem:[%s579_s0 + $0x28] sm:$0xff]   ;;  %v480_v13 = vld [vmem:[%s579_s0 + $0x30] sm:$0xff]   ;;  %v481_v14 = vld [vmem:[%s579_s0 + $0x18] sm:$0xff]  }
   0x6   :  { %v482_v15 = vld [vmem:[%s579_s0 + $0x38] sm:$0xff]   ;;  %v402_v16 = vld [vmem:[%s580_s2] ss:$0 sm:$0xff] }
   0x7   :  { %422 = vmatpush3.bf16.msra.mxu0 %v468_v1  ;;  %460 = vmatpush3.bf16.msra.mxu1 %v468_v1 }
   0x8   :  { %423 = vmatprep.subr.bf16.mxu0 %v469_v2  ;;  %453 = vmatprep.subr.bf16.mxu1 %v469_v2 }
   0xb   :  { %424 = vmatpush3.bf16.msra.mxu0 %v469_v2  ;;  %461 = vmatpush3.bf16.msra.mxu1 %v469_v2 }
   0xc   :  { %425 = vmatprep.subr.bf16.mxu0 %v470_v3  ;;  %454 = vmatprep.subr.bf16.mxu1 %v470_v3 }
   0xf   :  { %426 = vmatpush3.bf16.msra.mxu0 %v470_v3  ;;  %462 = vmatpush3.bf16.msra.mxu1 %v470_v3 }
  0x10   :  { %427 = vmatprep.subr.bf16.mxu0 %v471_v6  ;;  %455 = vmatprep.subr.bf16.mxu1 %v471_v6 }
  0x13   :  { %428 = vmatpush3.bf16.msra.mxu0 %v471_v6  ;;  %463 = vmatpush3.bf16.msra.mxu1 %v471_v6 }
  0x14   :  { %429 = vmatprep.subr.bf16.mxu0 %v472_v7  ;;  %456 = vmatprep.subr.bf16.mxu1 %v472_v7 }
  0x17   :  { %430 = vmatpush3.bf16.msra.mxu0 %v472_v7  ;;  %464 = vmatpush3.bf16.msra.mxu1 %v472_v7 }
  0x18   :  { %431 = vmatprep.subr.bf16.mxu0 %v473_v8  ;;  %457 = vmatprep.subr.bf16.mxu1 %v473_v8 }
  0x1b   :  { %432 = vmatpush3.bf16.msra.mxu0 %v473_v8  ;;  %465 = vmatpush3.bf16.msra.mxu1 %v473_v8 }
  0x1c   :  { %433 = vmatprep.subr.bf16.mxu0 %v474_v9  ;;  %458 = vmatprep.subr.bf16.mxu1 %v474_v9 }
  0x1f   :  { %434 = vmatpush3.bf16.msra.mxu0 %v474_v9  ;;  %466 = vmatpush3.bf16.msra.mxu1 %v474_v9 }
  0x22   :  { %436 = vmatmul.mubr.bf16.vlgmr.msra.gmra.mrb[0].mxu0 %v477_v10  ;;  %444 = vmatmul.mubr.bf16.vlgmr.msra.gmra.mrb[0].mxu1 %v478_v11 }
  0x23   :  { %439 = vmatprep.mubr.bf16.mxu0 %v479_v12  ;;  %447 = vmatprep.mubr.bf16.mxu1 %v480_v13 }
  0x2a   :  { %440 = vmatmul.mubr.bf16.gmra.mrb[4].mxu0 %v481_v14  ;;  %448 = vmatmul.mubr.bf16.gmra.mrb[4].mxu1 %v482_v15 }
  0xf5   :  { %v437_v17 = vpop.f32.mrb[0].mxu0  ;;  %v445_v18 = vpop.f32.mrb[0].mxu1 }
  0xf6   :  { %v336_v19 = vadd.f32 %v437_v17, %v402_v16  ;;  %v344_v20 = vadd.f32 %v445_v18, %v402_v16  ;;  %v213_v21 = vpop.f32.mrb[1].mxu0  ;;  %v245_v22 = vpop.f32.mrb[1].mxu1 }
  0xf7   :  { %v334_v23 = vadd.f32 %v402_v16, %v213_v21  ;;  %v342_v24 = vadd.f32 %v402_v16, %v245_v22  ;;  %v438_v25 = vpop.f32.mrb[2].mxu0  ;;  %v446_v26 = vpop.f32.mrb[2].mxu1 }
  0xf8   :  { %v337_v27 = vadd.f32 %v438_v25, %v402_v16  ;;  %v345_v28 = vadd.f32 %v446_v26, %v402_v16  ;;  %v216_v29 = vpop.f32.mrb[3].mxu0  ;;  %v248_v30 = vpop.f32.mrb[3].mxu1  ;;  %v352_v33 = vmax.f32 %v336_v19, 0.0  ;;  %v360_v34 = vmax.f32 %v344_v20, 0.0 }
  0xf9   :  { %v335_v31 = vadd.f32 %v402_v16, %v216_v29  ;;  %v343_v32 = vadd.f32 %v402_v16, %v248_v30  ;;  %v350_v37 = vmax.f32 %v334_v23, 0.0  ;;  %v358_v38 = vmax.f32 %v342_v24, 0.0 }
  0xfa   :  { %v353_v35 = vmax.f32 %v337_v27, 0.0  ;;  %v361_v36 = vmax.f32 %v345_v28, 0.0 }
  0xfb   :  { %v351_v39 = vmax.f32 %v335_v31, 0.0  ;;  %v359_v40 = vmax.f32 %v343_v32, 0.0 }
  0xfc   :  { %v367_v41 = vpack.c.bf16 %v353_v35, %v352_v33  ;;  %v371_v42 = vpack.c.bf16 %v361_v36, %v360_v34 }
  0xfd   :  { %v366_v43 = vpack.c.bf16 %v351_v39, %v350_v37  ;;  %v370_v44 = vpack.c.bf16 %v359_v40, %v358_v38  ;;  %v441_v45 = vpop.f32.mrb[4].mxu0  ;;  %v449_v46 = vpop.f32.mrb[4].mxu1 }
  0xfe   :  { %375 = vst [vmem:[%s581_s3 + $0x8] sm:$0xff] %v367_v41  ;;  %379 = vst [vmem:[%s581_s3 + $0x28] sm:$0xff] %v371_v42  ;;  %v340_v47 = vadd.f32 %v441_v45, %v402_v16  ;;  %v348_v48 = vadd.f32 %v449_v46, %v402_v16  ;;  %v229_v49 = vpop.f32.mrb[5].mxu0  ;;  %v261_v50 = vpop.f32.mrb[5].mxu1 }
  0xff   :  { %374 = vst [vmem:[%s581_s3] sm:$0xff] %v366_v43  ;;  %378 = vst [vmem:[%s581_s3 + $0x20] sm:$0xff] %v370_v44  ;;  %v338_v51 = vadd.f32 %v402_v16, %v229_v49  ;;  %v346_v52 = vadd.f32 %v402_v16, %v261_v50  ;;  %v442_v53 = vpop.f32.mrb[6].mxu0  ;;  %v450_v54 = vpop.f32.mrb[6].mxu1 }
 0x100   :  { %v341_v55 = vadd.f32 %v442_v53, %v402_v16  ;;  %v349_v56 = vadd.f32 %v450_v54, %v402_v16  ;;  %v232_v57 = vpop.f32.mrb[7].mxu0  ;;  %v264_v58 = vpop.f32.mrb[7].mxu1  ;;  %v356_v61 = vmax.f32 %v340_v47, 0.0  ;;  %v364_v62 = vmax.f32 %v348_v48, 0.0 }
 0x101   :  { %v339_v59 = vadd.f32 %v402_v16, %v232_v57  ;;  %v347_v60 = vadd.f32 %v402_v16, %v264_v58  ;;  %v354_v1 = vmax.f32 %v338_v51, 0.0  ;;  %v362_v2 = vmax.f32 %v346_v52, 0.0 }
 0x102   :  { %v357_v63 = vmax.f32 %v341_v55, 0.0  ;;  %v365_v0 = vmax.f32 %v349_v56, 0.0 }
 0x103   :  { %v355_v3 = vmax.f32 %v339_v59, 0.0  ;;  %v363_v4 = vmax.f32 %v347_v60, 0.0 }
 0x104   :  { %v369_v5 = vpack.c.bf16 %v357_v63, %v356_v61  ;;  %v373_v6 = vpack.c.bf16 %v365_v0, %v364_v62 }
 0x105   :  { %v368_v7 = vpack.c.bf16 %v355_v3, %v354_v1  ;;  %v372_v8 = vpack.c.bf16 %v363_v4, %v362_v2 }
 0x106   :  { %377 = vst [vmem:[%s581_s3 + $0x18] sm:$0xff] %v369_v5  ;;  %381 = vst [vmem:[%s581_s3 + $0x38] sm:$0xff] %v373_v6 }
 0x107   :  { %376 = vst [vmem:[%s581_s3 + $0x10] sm:$0xff] %v368_v7  ;;  %380 = vst [vmem:[%s581_s3 + $0x30] sm:$0xff] %v372_v8 }

</bundles_post_ra>
